<compile_context>
chip_gen: v5e
topology: v5e:2x2
jax: 0.10.0
libtpu: 0.0.40
codegen_flags: <defaults>
</compile_context>

<pallas_src>
import jax
import jax.numpy as jnp
from jax.experimental import pallas as pl
from jax.experimental.pallas import tpu as pltpu

INPUT_SIZE = 100
HIDDEN_SIZE = 100
OUTPUT_SIZE = 128

HID_PAD = 128          # hidden width padded to lane-dense 128
OUT_PAD = 128          # OUTPUT_SIZE is already 128

MAX_TILE_B = 4096      # rows per batch tile


def _round_up(x, m):
    return (x + m - 1) // m * m


def _fcru_kernel(x_ref, w1_ref, b1_ref, w2_ref, b2_ref, w3_ref, b3_ref, o_ref):
    """Fused 3-layer MLP on one (tb, 100) batch tile.

    Weights/biases are VMEM-resident across grid steps (constant index maps).
    Matmuls accumulate in f32; bias-add + ReLU epilogue stays f32.
    """
    cdt = w1_ref.dtype                       # compute dtype (bf16 or f32)
    x = x_ref[...].astype(cdt)               # in-kernel cast: free under DMA

    h1 = jnp.dot(x, w1_ref[...], preferred_element_type=jnp.float32)
    h1 = jnp.maximum(h1 + b1_ref[...], 0.0).astype(cdt)

    h2 = jnp.dot(h1, w2_ref[...], preferred_element_type=jnp.float32)
    h2 = jnp.maximum(h2 + b2_ref[...], 0.0).astype(cdt)

    out = jnp.dot(h2, w3_ref[...], preferred_element_type=jnp.float32)
    o_ref[...] = (out + b3_ref[...]).astype(o_ref.dtype)


def init_params(key):
    """torch.nn.Linear-style init: W (out,in), b (out,), U[-1/sqrt(fan_in), +]."""
    ks = jax.random.split(key, 6)

    def linear(kw, kb, fan_in, fan_out):
        bound = 1.0 / jnp.sqrt(jnp.float32(fan_in))
        w = jax.random.uniform(kw, (fan_out, fan_in), jnp.float32, -bound, bound)
        b = jax.random.uniform(kb, (fan_out,), jnp.float32, -bound, bound)
        return w, b

    w1, b1 = linear(ks[0], ks[1], INPUT_SIZE, HIDDEN_SIZE)
    w2, b2 = linear(ks[2], ks[3], HIDDEN_SIZE, HIDDEN_SIZE)
    w3, b3 = linear(ks[4], ks[5], HIDDEN_SIZE, OUTPUT_SIZE)
    return (w1, b1, w2, b2, w3, b3)


def prepare_params(params, compute_dtype=jnp.bfloat16):
    """One-time: transpose to (in, out), zero-pad hidden/output dims to 128,
    cast matmul operands to compute_dtype.  w1 keeps its 100-row input dim so
    the unpadded (B, 100) x feeds it directly.  Biases stay f32 (f32 epilogue).
    """
    w1, b1, w2, b2, w3, b3 = params

    def pad_w(w_t, rows, cols):
        return jnp.pad(w_t, ((0, rows - w_t.shape[0]), (0, cols - w_t.shape[1])))

    def pad_b(b, cols):
        return jnp.pad(b, (0, cols - b.shape[0])).reshape(1, cols).astype(jnp.float32)

    w1t = pad_w(w1.T, INPUT_SIZE, HID_PAD).astype(compute_dtype)   # (100, 128)
    w2t = pad_w(w2.T, HID_PAD, HID_PAD).astype(compute_dtype)      # (128, 128)
    w3t = pad_w(w3.T, HID_PAD, OUT_PAD).astype(compute_dtype)      # (128, 128)
    b1r = pad_b(b1, HID_PAD)
    b2r = pad_b(b2, HID_PAD)
    b3r = pad_b(b3, OUT_PAD)
    return (w1t, b1r, w2t, b2r, w3t, b3r)


def _choose_tile(B, max_tile_b):
    """Pick the batch-tile size: one tile for small B; for large B make the
    tile count even so the parallel grid balances over v7x's 2 TensorCores."""
    if B <= max_tile_b:
        return _round_up(max(B, 8), 8)
    n_tiles = pl.cdiv(B, max_tile_b)
    if n_tiles % 2:
        n_tiles += 1
    return _round_up(pl.cdiv(B, n_tiles), 8)


def net_fcru_forward(x, prepared_params, *, max_tile_b=MAX_TILE_B,
                     out_dtype=jnp.float32):
    """x: any shape whose elements flatten to (B, INPUT_SIZE) rows."""
    w1t, b1r, w2t, b2r, w3t, b3r = prepared_params

    x2d = x.reshape(-1, INPUT_SIZE)            # matches x.view(-1, input_size)
    B = x2d.shape[0]

    tb = _choose_tile(B, max_tile_b)
    grid = (pl.cdiv(B, tb),)                   # ragged last block handled by Pallas

    x_bytes = jnp.dtype(x2d.dtype).itemsize
    w_bytes = jnp.dtype(w1t.dtype).itemsize
    o_bytes = jnp.dtype(out_dtype).itemsize
    weight_bytes = (INPUT_SIZE * HID_PAD + HID_PAD * HID_PAD
                    + HID_PAD * OUT_PAD) * w_bytes \
        + (HID_PAD + HID_PAD + OUT_PAD) * 4
    cost = pl.CostEstimate(
        flops=2 * B * (INPUT_SIZE * HID_PAD + HID_PAD * HID_PAD + HID_PAD * OUT_PAD),
        transcendentals=0,
        bytes_accessed=B * (INPUT_SIZE * x_bytes + OUT_PAD * o_bytes) + weight_bytes,
    )

    out = pl.pallas_call(
        _fcru_kernel,
        out_shape=jax.ShapeDtypeStruct((B, OUT_PAD), out_dtype),
        grid=grid,
        in_specs=[
            pl.BlockSpec((tb, INPUT_SIZE), lambda i: (i, 0)),        # x tile (pipelined)
            pl.BlockSpec((INPUT_SIZE, HID_PAD), lambda i: (0, 0)),   # w1 (resident)
            pl.BlockSpec((1, HID_PAD), lambda i: (0, 0)),            # b1
            pl.BlockSpec((HID_PAD, HID_PAD), lambda i: (0, 0)),      # w2
            pl.BlockSpec((1, HID_PAD), lambda i: (0, 0)),            # b2
            pl.BlockSpec((HID_PAD, OUT_PAD), lambda i: (0, 0)),      # w3
            pl.BlockSpec((1, OUT_PAD), lambda i: (0, 0)),            # b3
        ],
        out_specs=pl.BlockSpec((tb, OUT_PAD), lambda i: (i, 0)),
        compiler_params=pltpu.CompilerParams(
            dimension_semantics=("parallel",),
            vmem_limit_bytes=32 * 1024 * 1024,   # headroom for 4096-row f32 tiles on v5e
        ),
        cost_estimate=cost,
    )(x2d, w1t, b1r, w2t, b2r, w3t, b3r)

    return out            # OUT_PAD == OUTPUT_SIZE == 128: no trailing slice needed


def reference_forward(x, params):
    w1, b1, w2, b2, w3, b3 = params
    x2d = x.reshape(-1, INPUT_SIZE).astype(jnp.float32)
    h1 = jnp.maximum(x2d @ w1.T + b1, 0.0)
    h2 = jnp.maximum(h1 @ w2.T + b2, 0.0)
    return h2 @ w3.T + b3


# TODO(synk): ContinualLearner's EWC bookkeeping (estimate_fisher / ewc_loss) is
# training-time host logic outside the forward pass; not implemented as a kernel.


if __name__ == "__main__":
    key = jax.random.PRNGKey(0)
    k_param, k_x1, k_x2 = jax.random.split(key, 3)

    params = init_params(k_param)

    # --- Small-batch path (single tile), f32 compute, tight tolerance. ---
    x_small = jax.random.normal(k_x1, (8, INPUT_SIZE), jnp.float32)
    prep_f32 = prepare_params(params, compute_dtype=jnp.float32)
    out_small = jax.block_until_ready(net_fcru_forward(x_small, prep_f32))
    ref_small = reference_forward(x_small, params)
    assert out_small.shape == (8, OUTPUT_SIZE), out_small.shape
    assert jnp.allclose(out_small, ref_small, atol=1e-4, rtol=1e-4), \
        "f32 path mismatch vs reference"

    # --- Multi-tile / ragged path: B=600 with a reduced tile (152 rows, 4
    #     tiles, partial last block) exercises the cdiv grid + write masking.
    #     bf16 matmul operands with f32 accumulation (default config). ---
    x_big = jax.random.normal(k_x2, (600, INPUT_SIZE), jnp.float32)
    prep_bf16 = prepare_params(params, compute_dtype=jnp.bfloat16)
    out_big = jax.block_until_ready(
        net_fcru_forward(x_big, prep_bf16, max_tile_b=256))
    ref_big = reference_forward(x_big, params)
    assert out_big.shape == (600, OUTPUT_SIZE), out_big.shape
    assert jnp.allclose(out_big, ref_big, atol=5e-2, rtol=5e-2), \
        "bf16 path mismatch vs reference"

    print("KERNEL_OK")
</pallas_src>

<mosaic_0001>
module attributes {stable_mosaic.version = 11 : i64} {
  func.func @_fcru_kernel(%arg0: i32, %arg1: memref<8x100xf32, #tpu.memory_space<vmem>>, %arg2: memref<100x128xf32, #tpu.memory_space<vmem>>, %arg3: memref<1x128xf32, #tpu.memory_space<vmem>>, %arg4: memref<128x128xf32, #tpu.memory_space<vmem>>, %arg5: memref<1x128xf32, #tpu.memory_space<vmem>>, %arg6: memref<128x128xf32, #tpu.memory_space<vmem>>, %arg7: memref<1x128xf32, #tpu.memory_space<vmem>>, %arg8: memref<8x128xf32, #tpu.memory_space<vmem>>) attributes {dimension_semantics = [#tpu.dimension_semantics<parallel>], iteration_bounds = array<i64: 1>, scalar_prefetch = 0 : i64, scratch_operands = 0 : i64, tpu.core_type = #tpu.core_type<tc>, window_params = [{transform_indices = @transform_0, window_bounds = array<i64: 8, 100>}, {pipeline_mode = #tpu.pipeline_mode<synchronous>, transform_indices = @transform_1, window_bounds = array<i64: 100, 128>}, {pipeline_mode = #tpu.pipeline_mode<synchronous>, transform_indices = @transform_2, window_bounds = array<i64: 1, 128>}, {pipeline_mode = #tpu.pipeline_mode<synchronous>, transform_indices = @transform_3, window_bounds = array<i64: 128, 128>}, {pipeline_mode = #tpu.pipeline_mode<synchronous>, transform_indices = @transform_4, window_bounds = array<i64: 1, 128>}, {pipeline_mode = #tpu.pipeline_mode<synchronous>, transform_indices = @transform_5, window_bounds = array<i64: 128, 128>}, {pipeline_mode = #tpu.pipeline_mode<synchronous>, transform_indices = @transform_6, window_bounds = array<i64: 1, 128>}, {transform_indices = @transform_7, window_bounds = array<i64: 8, 128>}]} {
    %c0 = arith.constant 0 : index
    %c0_0 = arith.constant 0 : index
    %0 = vector.load %arg1[%c0, %c0_0] : memref<8x100xf32, #tpu.memory_space<vmem>>, vector<8x100xf32>
    %c0_1 = arith.constant 0 : index
    %c0_2 = arith.constant 0 : index
    %1 = vector.load %arg2[%c0_1, %c0_2] : memref<100x128xf32, #tpu.memory_space<vmem>>, vector<100x128xf32>
    %cst = arith.constant dense<0.000000e+00> : vector<8x128xf32>
    %2 = tpu.matmul %0, %1, %cst {dimension_numbers = #tpu.dot_dimension_numbers<[1], [0], [0], [1], [0, 0, 1, 1], [], []>} : vector<8x100xf32>, vector<100x128xf32>, vector<8x128xf32> -> vector<8x128xf32>
    %c0_3 = arith.constant 0 : index
    %c0_4 = arith.constant 0 : index
    %3 = vector.load %arg3[%c0_3, %c0_4] : memref<1x128xf32, #tpu.memory_space<vmem>>, vector<1x128xf32>
    %4 = vector.broadcast %3 : vector<1x128xf32> to vector<8x128xf32>
    %5 = arith.addf %2, %4 : vector<8x128xf32>
    %cst_5 = arith.constant 0.000000e+00 : f32
    %6 = vector.broadcast %cst_5 : f32 to vector<8x128xf32>
    %7 = arith.maximumf %5, %6 : vector<8x128xf32>
    %c0_6 = arith.constant 0 : index
    %c0_7 = arith.constant 0 : index
    %8 = vector.load %arg4[%c0_6, %c0_7] : memref<128x128xf32, #tpu.memory_space<vmem>>, vector<128x128xf32>
    %cst_8 = arith.constant dense<0.000000e+00> : vector<8x128xf32>
    %9 = tpu.matmul %7, %8, %cst_8 {dimension_numbers = #tpu.dot_dimension_numbers<[1], [0], [0], [1], [0, 0, 1, 1], [], []>} : vector<8x128xf32>, vector<128x128xf32>, vector<8x128xf32> -> vector<8x128xf32>
    %c0_9 = arith.constant 0 : index
    %c0_10 = arith.constant 0 : index
    %10 = vector.load %arg5[%c0_9, %c0_10] : memref<1x128xf32, #tpu.memory_space<vmem>>, vector<1x128xf32>
    %11 = vector.broadcast %10 : vector<1x128xf32> to vector<8x128xf32>
    %12 = arith.addf %9, %11 : vector<8x128xf32>
    %cst_11 = arith.constant 0.000000e+00 : f32
    %13 = vector.broadcast %cst_11 : f32 to vector<8x128xf32>
    %14 = arith.maximumf %12, %13 : vector<8x128xf32>
    %c0_12 = arith.constant 0 : index
    %c0_13 = arith.constant 0 : index
    %15 = vector.load %arg6[%c0_12, %c0_13] : memref<128x128xf32, #tpu.memory_space<vmem>>, vector<128x128xf32>
    %cst_14 = arith.constant dense<0.000000e+00> : vector<8x128xf32>
    %16 = tpu.matmul %14, %15, %cst_14 {dimension_numbers = #tpu.dot_dimension_numbers<[1], [0], [0], [1], [0, 0, 1, 1], [], []>} : vector<8x128xf32>, vector<128x128xf32>, vector<8x128xf32> -> vector<8x128xf32>
    %c0_15 = arith.constant 0 : index
    %c0_16 = arith.constant 0 : index
    %17 = vector.load %arg7[%c0_15, %c0_16] : memref<1x128xf32, #tpu.memory_space<vmem>>, vector<1x128xf32>
    %18 = vector.broadcast %17 : vector<1x128xf32> to vector<8x128xf32>
    %19 = arith.addf %16, %18 : vector<8x128xf32>
    %c0_17 = arith.constant 0 : index
    %c0_18 = arith.constant 0 : index
    %20 = vector.load %arg8[%c0_17, %c0_18] : memref<8x128xf32, #tpu.memory_space<vmem>>, vector<8x128xf32>
    tpu.vector_store %arg8[%c0_17, %c0_18], %19 {strides = array<i32>} : memref<8x128xf32, #tpu.memory_space<vmem>>, vector<8x128xf32>,
    return
  }
  func.func @transform_0(%arg0: i32) -> (i32, i32) {
    %c0_i32 = arith.constant 0 : i32
    %c0_i32_0 = arith.constant 0 : i32
    return %arg0, %c0_i32 : i32, i32
  }
  func.func @transform_1(%arg0: i32) -> (i32, i32) {
    %c0_i32 = arith.constant 0 : i32
    %c0_i32_0 = arith.constant 0 : i32
    %c0_i32_1 = arith.constant 0 : i32
    return %c0_i32, %c0_i32_0 : i32, i32
  }
  func.func @transform_2(%arg0: i32) -> (i32, i32) {
    %c0_i32 = arith.constant 0 : i32
    %c0_i32_0 = arith.constant 0 : i32
    %c0_i32_1 = arith.constant 0 : i32
    return %c0_i32, %c0_i32_0 : i32, i32
  }
  func.func @transform_3(%arg0: i32) -> (i32, i32) {
    %c0_i32 = arith.constant 0 : i32
    %c0_i32_0 = arith.constant 0 : i32
    %c0_i32_1 = arith.constant 0 : i32
    return %c0_i32, %c0_i32_0 : i32, i32
  }
  func.func @transform_4(%arg0: i32) -> (i32, i32) {
    %c0_i32 = arith.constant 0 : i32
    %c0_i32_0 = arith.constant 0 : i32
    %c0_i32_1 = arith.constant 0 : i32
    return %c0_i32, %c0_i32_0 : i32, i32
  }
  func.func @transform_5(%arg0: i32) -> (i32, i32) {
    %c0_i32 = arith.constant 0 : i32
    %c0_i32_0 = arith.constant 0 : i32
    %c0_i32_1 = arith.constant 0 : i32
    return %c0_i32, %c0_i32_0 : i32, i32
  }
  func.func @transform_6(%arg0: i32) -> (i32, i32) {
    %c0_i32 = arith.constant 0 : i32
    %c0_i32_0 = arith.constant 0 : i32
    %c0_i32_1 = arith.constant 0 : i32
    return %c0_i32, %c0_i32_0 : i32, i32
  }
  func.func @transform_7(%arg0: i32) -> (i32, i32) {
    %c0_i32 = arith.constant 0 : i32
    %c0_i32_0 = arith.constant 0 : i32
    return %arg0, %c0_i32 : i32, i32
  }
}

</mosaic_0001>

<bundles_post_ra>
// kernel: tpu_custom_call.1
= control target key start
LH: loop header
LB: loop body
LE: loop exit
PB: predicated region body
PF: predicated region fallthrough
CT: control target
= control target key end

     0   :  { %12 = vsyncpa [#allocation3], 0  ;;  %s447_s0 = inlined_call_operand.hbm [shape: f32[8,100], index: 0, kind: input, shape index: {}]   ;;  %s448_s1 = inlined_call_operand.hbm [shape: f32[100,128], index: 1, kind: input, shape index: {}]   ;;  %s449_s2 = inlined_call_operand.vmem [shape: f32[1,128], index: 2, kind: input, shape index: {}]   ;;  %s450_s3 = inlined_call_operand.hbm [shape: f32[128,128], index: 3, kind: input, shape index: {}]   ;;  %s451_s4 = inlined_call_operand.vmem [shape: f32[1,128], index: 4, kind: input, shape index: {}]   ;;  %s452_s5 = inlined_call_operand.hbm [shape: f32[128,128], index: 5, kind: input, shape index: {}]   ;;  %s453_s6 = inlined_call_operand.vmem [shape: f32[1,128], index: 6, kind: input, shape index: {}]   ;;  %s454_s7 = inlined_call_operand.hbm [shape: f32[8,128], index: 7, kind: output, shape index: {}]  }
   0x1   :  { %13 = vsyncpa [#allocation6], 0 }
   0x2   :  { %14 = vsyncpa [#allocation9], 0  ;;  %s31_s26 = sshll.u32 %s448_s1, 4  ;;  %s32_s26 = int_to_ptr.hbm [resolvable:$true] %s31_s26 }
   0x3   :  { %15 = vsyncpa [#allocation4], 0  ;;  %s376_s27 = smov [#allocation5]   ;;  %s21_s8 = sshll.u32 %s447_s0, 4  ;;  %s22_s8 = int_to_ptr.hbm [resolvable:$true] %s21_s8 }
   0x4   :  { %s33_s28 = sshll.u32 %s376_s27, 4  ;;  %s377_s9 = smov 128   ;;  %s34_s28 = int_to_ptr.vmem [resolvable:$true] %s33_s28 }
   0x5   :  { %s378_s10 = smov 8   ;;  %s379_s11 = smov [#allocation2]  }
   0x6   :  { %39 = dma.hbm_to_vmem [thread:$0]  %s32_s26, 1664, %s34_s28, [#allocation6], %s377_s9, %s377_s9, %s378_s10  }
   0x7   :  { %s23_s12 = sshll.u32 %s379_s11, 4  ;;  %s46_s15 = sshll.u32 %s450_s3, 4  ;;  %s24_s12 = int_to_ptr.vmem [resolvable:$true] %s23_s12  ;;  %s47_s15 = int_to_ptr.hbm [resolvable:$true] %s46_s15 }
   0x8   :  { %26 = dma.hbm_to_vmem [thread:$0]  %s22_s8, 128, %s24_s12, [#allocation3]  }
   0x9   :  { %s61_s17 = sshll.u32 %s452_s5, 4  ;;  %s380_s18 = smov [#allocation7]   ;;  %s62_s17 = int_to_ptr.hbm [resolvable:$true] %s61_s17 }
   0xa   :  { %s48_s19 = sshll.u32 %s380_s18, 4  ;;  %s381_s0 = smov [#allocation8]   ;;  %s49_s19 = int_to_ptr.vmem [resolvable:$true] %s48_s19 }
   0xb   :  { %54 = dma.hbm_to_vmem [thread:$0]  %s47_s15, 2048, %s49_s19, [#allocation6], %s377_s9, %s377_s9, %s378_s10  }
   0xc   :  { %s63_s20 = sshll.u32 %s381_s0, 4  ;;  %s64_s20 = int_to_ptr.vmem [resolvable:$true] %s63_s20 }
   0xd   :  { %69 = dma.hbm_to_vmem [thread:$0]  %s62_s17, 2048, %s64_s20, [#allocation9], %s377_s9, %s377_s9, %s378_s10  }
   0xe   :  { %368 = dma.done.wait [#allocation3], 128  }
   0xf   :  { %369 = vsyncadd [#allocation3], 4294967168 }
  0x10   :  { %370 = dma.done.wait [#allocation6], 3712  }
  0x11   :  { %371 = vsyncadd [#allocation6], 4294963584 }
  0x12   :  { %372 = dma.done.wait [#allocation9], 2048  }
  0x13   :  { %373 = vsyncadd [#allocation9], 4294965248  ;;  %vm110_vm0 = vcmask 1043456   ;;  %v101_v0 = vld [vmem:[#allocation5 + $0x60] sm:$0xf]  ;;  %v100_v1 = vld [vmem:[#allocation5 + $0x58] sm:$0xff] }
  0x14   :  { %236 = vmatpush.msk.msra.mxu0 %vm110_vm0, %v101_v0  ;;  %v99_v2 = vld [vmem:[#allocation5 + $0x50] sm:$0xff]  ;;  %v98_v3 = vld [vmem:[#allocation5 + $0x48] sm:$0xff]  ;;  %v150_v4 = vld [vmem:[#allocation7 + $0x78] sm:$0xff]  ;;  %vm106_vm1 = vcmask 818176   ;;  %s382_s24 = smov [#allocation10]   ;;  %s224_s28 = sshll.u32 %s454_s7, 4  ;;  %s225_s28 = int_to_ptr.hbm [resolvable:$true] %s224_s28 }
  0x15   :  { %155 = vmatpush.msra.mxu1 %v150_v4  ;;  %v149_v5 = vld [vmem:[#allocation7 + $0x70] sm:$0xff]  ;;  %v97_v6 = vld [vmem:[#allocation5 + $0x40] sm:$0xff]  ;;  %v148_v7 = vld [vmem:[#allocation7 + $0x68] sm:$0xff]  ;;  %s222_s25 = sshll.u32 %s382_s24, 4  ;;  %s223_s25 = int_to_ptr.vmem [resolvable:$true] %s222_s25 }
  0x16   :  { %118 = vmatpush.msra.mxu0 %v100_v1  ;;  %v96_v8 = vld [vmem:[#allocation5 + $0x38] sm:$0xff]  ;;  %v147_v9 = vld [vmem:[#allocation7 + $0x60] sm:$0xff]  ;;  %v95_v10 = vld [vmem:[#allocation5 + $0x30] sm:$0xff] }
  0x17   :  { %156 = vmatpush.msra.mxu1 %v149_v5  ;;  %v146_v11 = vld [vmem:[#allocation7 + $0x58] sm:$0xff]  ;;  %v94_v12 = vld [vmem:[#allocation5 + $0x28] sm:$0xff]  ;;  %v145_v13 = vld [vmem:[#allocation7 + $0x50] sm:$0xff] }
  0x18   :  { %119 = vmatpush.msra.mxu0 %v99_v2  ;;  %v93_v14 = vld [vmem:[#allocation5 + $0x20] sm:$0xff]  ;;  %v144_v15 = vld [vmem:[#allocation7 + $0x48] sm:$0xff]  ;;  %v92_v16 = vld [vmem:[#allocation5 + $0x18] sm:$0xff] }
  0x19   :  { %157 = vmatpush.msra.mxu1 %v148_v7  ;;  %v143_v17 = vld [vmem:[#allocation7 + $0x40] sm:$0xff]  ;;  %v91_v18 = vld [vmem:[#allocation5 + $0x10] sm:$0xff]  ;;  %v142_v19 = vld [vmem:[#allocation7 + $0x38] sm:$0xff] }
  0x1a   :  { %120 = vmatpush.msra.mxu0 %v98_v3  ;;  %v90_v20 = vld [vmem:[#allocation5 + $0x8] sm:$0xff]  ;;  %v141_v21 = vld [vmem:[#allocation7 + $0x30] sm:$0xff]  ;;  %v89_v22 = vld [vmem:[#allocation5] sm:$0xff] }
  0x1b   :  { %158 = vmatpush.msra.mxu1 %v147_v9  ;;  %v140_v23 = vld [vmem:[#allocation7 + $0x28] sm:$0xff]  ;;  %v88_v24 = vld [vmem:[#allocation2] sm:$0xff]  ;;  %v139_v25 = vld [vmem:[#allocation7 + $0x20] sm:$0xff] }
  0x1c   :  { %121 = vmatpush.msra.mxu0 %v97_v6  ;;  %v138_v26 = vld [vmem:[#allocation7 + $0x18] sm:$0xff]  ;;  %v137_v27 = vld [vmem:[#allocation7 + $0x10] sm:$0xff]  ;;  %v136_v28 = vld [vmem:[#allocation7 + $0x8] sm:$0xff] }
  0x1d   :  { %159 = vmatpush.msra.mxu1 %v146_v11  ;;  %v135_v29 = vld [vmem:[#allocation7] sm:$0xff]  ;;  %v191_v30 = vld [vmem:[#allocation8 + $0x78] sm:$0xff]  ;;  %v190_v31 = vld [vmem:[#allocation8 + $0x70] sm:$0xff] }
  0x1e   :  { %122 = vmatpush.msra.mxu0 %v96_v8  ;;  %196 = vmatpush.msra.mxu2 %v191_v30  ;;  %v189_v32 = vld [vmem:[#allocation8 + $0x68] sm:$0xff]  ;;  %v188_v33 = vld [vmem:[#allocation8 + $0x60] sm:$0xff]  ;;  %v187_v34 = vld [vmem:[#allocation8 + $0x58] sm:$0xff] }
  0x1f   :  { %160 = vmatpush.msra.mxu1 %v145_v13  ;;  %v186_v35 = vld [vmem:[#allocation8 + $0x50] sm:$0xff]  ;;  %v185_v36 = vld [vmem:[#allocation8 + $0x48] sm:$0xff]  ;;  %v184_v37 = vld [vmem:[#allocation8 + $0x40] sm:$0xff] }
  0x20   :  { %123 = vmatpush.msra.mxu0 %v95_v10  ;;  %197 = vmatpush.msra.mxu2 %v190_v31  ;;  %v183_v38 = vld [vmem:[#allocation8 + $0x38] sm:$0xff]  ;;  %v182_v39 = vld [vmem:[#allocation8 + $0x30] sm:$0xff]  ;;  %v181_v40 = vld [vmem:[#allocation8 + $0x28] sm:$0xff] }
  0x21   :  { %161 = vmatpush.msra.mxu1 %v144_v15  ;;  %v180_v41 = vld [vmem:[#allocation8 + $0x20] sm:$0xff]  ;;  %v179_v42 = vld [vmem:[#allocation8 + $0x18] sm:$0xff]  ;;  %v245_v43 = vld [vmem:[%s449_s2] ss:$0 sm:$0xff] }
  0x22   :  { %124 = vmatpush.msra.mxu0 %v94_v12  ;;  %198 = vmatpush.msra.mxu2 %v189_v32  ;;  %v178_v47 = vld [vmem:[#allocation8 + $0x10] sm:$0xff]  ;;  %v177_v48 = vld [vmem:[#allocation8 + $0x8] sm:$0xff]  ;;  %v176_v49 = vld [vmem:[#allocation8] sm:$0xff] }
  0x23   :  { %162 = vmatpush.msra.mxu1 %v143_v17  ;;  %v246_v50 = vld [vmem:[%s451_s4] ss:$0 sm:$0xff] }
  0x24   :  { %125 = vmatpush.msra.mxu0 %v93_v14  ;;  %199 = vmatpush.msra.mxu2 %v188_v33  ;;  %v247_v54 = vld [vmem:[%s453_s6] ss:$0 sm:$0xff] }
  0x25   :  { %163 = vmatpush.msra.mxu1 %v142_v19 }
  0x26   :  { %126 = vmatpush.msra.mxu0 %v92_v16  ;;  %200 = vmatpush.msra.mxu2 %v187_v34 }
  0x27   :  { %164 = vmatpush.msra.mxu1 %v141_v21 }
  0x28   :  { %127 = vmatpush.msra.mxu0 %v91_v18  ;;  %201 = vmatpush.msra.mxu2 %v186_v35 }
  0x29   :  { %165 = vmatpush.msra.mxu1 %v140_v23 }
  0x2a   :  { %128 = vmatpush.msra.mxu0 %v90_v20  ;;  %202 = vmatpush.msra.mxu2 %v185_v36 }
  0x2b   :  { %166 = vmatpush.msra.mxu1 %v139_v25 }
  0x2c   :  { %129 = vmatpush.msra.mxu0 %v89_v22  ;;  %203 = vmatpush.msra.mxu2 %v184_v37 }
  0x2d   :  { %237 = vmatmul.msk.f32.vlgmr.msra.gmra.mxu0 %vm106_vm1, %v88_v24  ;;  %167 = vmatpush.msra.mxu1 %v138_v26 }
  0x2e   :  { %204 = vmatpush.msra.mxu2 %v183_v38 }
  0x2f   :  { %168 = vmatpush.msra.mxu1 %v137_v27 }
  0x30   :  { %205 = vmatpush.msra.mxu2 %v182_v39 }
  0x31   :  { %169 = vmatpush.msra.mxu1 %v136_v28 }
  0x32   :  { %206 = vmatpush.msra.mxu2 %v181_v40 }
  0x33   :  { %170 = vmatpush.msra.mxu1 %v135_v29 }
  0x34   :  { %207 = vmatpush.msra.mxu2 %v180_v41 }
  0x36   :  { %208 = vmatpush.msra.mxu2 %v179_v42 }
  0x38   :  { %209 = vmatpush.msra.mxu2 %v178_v47 }
  0x3a   :  { %210 = vmatpush.msra.mxu2 %v177_v48 }
  0x3c   :  { %211 = vmatpush.msra.mxu2 %v176_v49 }
  0xaa   :  { %v131_v44 = vpop.f32.mrf.mxu0 }
  0xab   :  { %v132_v45 = vadd.f32 %v245_v43, %v131_v44 }
  0xad   :  { %v134_v46 = vmax.f32 %v132_v45, 0.0 }
  0xaf   :  { %171 = vmatmul.f32.vlgmr.msra.gmra.mxu1 %v134_v46 }
 0x12c   :  { %v172_v51 = vpop.f32.mrf.mxu1 }
 0x12d   :  { %v173_v52 = vadd.f32 %v246_v50, %v172_v51 }
 0x12f   :  { %v175_v53 = vmax.f32 %v173_v52, 0.0 }
 0x131   :  { %212 = vmatmul.f32.vlgmr.msra.gmra.mxu2 %v175_v53 }
 0x1b4   :  { %v213_v55 = vpop.f32.mrf.mxu2 }
 0x1b5   :  { %v214_v56 = vadd.f32 %v247_v54, %v213_v55 }
 0x1b7   :  { %216 = vst [vmem:[#allocation10] sm:$0xff] %v214_v56 }
 0x1b8   :  { %227 = dma.vmem_to_hbm [thread:$0]  %s223_s25, 128, %s225_s28, [#allocation4]  }
 0x1b9   :  { %374 = dma.done.wait [#allocation4], 128  }
 0x1ba   :  { %375 = vsyncadd [#allocation4], 4294967168 }
 0x1bb   :  { %232 = vsyncpa [#allocation3], 1 }
 0x1bc   :  { %233 = vsyncpa [#allocation6], 1 }
 0x1bd   :  { %234 = vsyncpa [#allocation9], 1 }
 0x1be   :  { %235 = vsyncpa [#allocation4], 1 }

</bundles_post_ra>
